<compile_context>
chip_gen: v5e
topology: v5e:2x2
jax: 0.10.0
libtpu: 0.0.40
codegen_flags: <defaults>
</compile_context>

<pallas_src>
import math
import jax
import jax.numpy as jnp
from jax.experimental import pallas as pl
from jax.experimental.pallas import tpu as pltpu


def _round_up(x, m):
    return (x + m - 1) // m * m


def _vmem_capacity_bytes():
    try:
        return int(pltpu.get_tpu_info().vmem_capacity_bytes)
    except Exception:
        return 64 * 1024 * 1024  # conservative (v7x-sized) fallback


def _num_tensorcores():
    try:
        kind = jax.devices()[0].device_kind.lower()
        if "v7" in kind or "7x" in kind:
            return 2
    except Exception:
        pass
    return 1


def _vmem_estimate(tm, th, d_model, x_dtype, w_dtype, o_dtype):
    xi = jnp.dtype(x_dtype).itemsize
    wi = jnp.dtype(w_dtype).itemsize
    oi = jnp.dtype(o_dtype).itemsize
    return (2 * tm * d_model * xi            # double-buffered x tile
            + 2 * d_model * th * wi          # double-buffered W1 slab
            + 2 * th * d_model * wi          # double-buffered W2 slab
            + 2 * (th + d_model) * wi        # biases
            + 2 * tm * d_model * oi          # double-buffered output tile
            + tm * d_model * 4)              # f32 accumulator scratch


def _make_ffn_kernel(th, ff_hidden, mask_tail):
    """Build kernel body. mask_tail statically enables masking of the padded
    hidden columns/rows of the last H block (when ff_hidden % th != 0)."""

    def kernel(x_ref, w1_ref, b1_ref, w2_ref, b2_ref, o_ref, acc_ref):
        # x_ref:(TM,D)  w1_ref:(D,TH)  b1_ref:(1,TH)  w2_ref:(TH,D)  b2_ref:(1,D)
        # o_ref:(TM,D)  acc_ref:(TM,D) f32, resident across the H grid axis.
        h_idx = pl.program_id(1)
        n_h = pl.num_programs(1)

        @pl.when(h_idx == 0)
        def _():
            acc_ref[...] = jnp.zeros_like(acc_ref)

        # c_fc slice: (TM, D) @ (D, TH) on the MXU, f32 accumulation.
        h = jnp.dot(x_ref[...], w1_ref[...], preferred_element_type=jnp.float32)
        h = h + b1_ref[...].astype(jnp.float32)

        # GELU (tanh approximation) in f32; tanh lowers to the EUP.
        g = jax.nn.gelu(h, approximate=True)
        w2 = w2_ref[...]

        if mask_tail:
            # Last H block is partial: zero padded hidden columns of g and the
            # corresponding (garbage-loaded) rows of W2 so they contribute 0.
            valid = jnp.minimum(ff_hidden - h_idx * th, th)
            col = jax.lax.broadcasted_iota(jnp.int32, g.shape, 1)
            g = jnp.where(col < valid, g, 0.0)
            row = jax.lax.broadcasted_iota(jnp.int32, w2.shape, 0)
            w2 = jnp.where(row < valid, w2, jnp.zeros_like(w2))

        # Partial c_proj contribution: (TM, TH) @ (TH, D), accumulated in f32.
        acc_ref[...] += jnp.dot(g.astype(w2.dtype), w2,
                                preferred_element_type=jnp.float32)

        @pl.when(h_idx == n_h - 1)
        def _():
            o_ref[...] = (acc_ref[...]
                          + b2_ref[...].astype(jnp.float32)).astype(o_ref.dtype)

    return kernel


def feed_forward_pallas(x, w1, b1, w2, b2, *, tile_m=None, tile_h=None):
    """x: (..., d_model). w1: (d_model, ff_hidden), b1: (ff_hidden,),
    w2: (ff_hidden, d_model), b2: (d_model,).  Weights are stored transposed
    relative to nn.Linear, i.e. (in_features, out_features)."""
    orig_shape = x.shape
    d_model = orig_shape[-1]
    ff_hidden = w1.shape[1]

    x2 = x.reshape(-1, d_model)
    M = x2.shape[0]

    # Dtype-dependent sublane granule: 8 (f32), 16 (bf16), 32 (int8/fp8).
    granule = max(8, 32 // jnp.dtype(x.dtype).itemsize)

    # Generation-aware VMEM budget and default tile sizes.
    cap = _vmem_capacity_bytes()
    vmem_limit = max(32 << 20, min(int(cap * 0.85), cap - (8 << 20)))
    budget = vmem_limit - (6 << 20)          # headroom for Mosaic internal scratch
    big_vmem = cap >= (96 << 20)             # v5e/v6e (128 MiB) vs v7x (64 MiB)

    tm_target = tile_m if tile_m is not None else (1024 if big_vmem else 512)
    th_target = tile_h if tile_h is not None else (1024 if big_vmem else 512)

    # Row tile: as large as possible (compute-bound), rounded to the granule.
    tm = min(tm_target, _round_up(M, granule))
    tm = max(granule, (tm // granule) * granule)

    # Hidden tile: full ff_hidden if it fits, otherwise a multiple of 128.
    if ff_hidden <= th_target:
        th = ff_hidden
    else:
        th = max(128, (min(th_target, ff_hidden) // 128) * 128)

    # Shrink tiles until the double-buffered working set fits the VMEM budget.
    while _vmem_estimate(tm, th, d_model, x.dtype, w1.dtype, x.dtype) > budget:
        if th > 256 and th < ff_hidden:
            th //= 2
        elif tm > 2 * granule:
            tm = max(granule, ((tm // 2 + granule - 1) // granule) * granule)
        else:
            break

    # Resolve ff_hidden % th != 0: prefer a nearby multiple-of-128 divisor,
    # otherwise mask the tail H block inside the kernel.
    mask_tail = False
    if ff_hidden % th != 0:
        div = 0
        for cand in range(th, 127, -128):
            if ff_hidden % cand == 0:
                div = cand
                break
        if div >= th // 2 and div > 0:
            th = div
        else:
            mask_tail = True

    # v7x has 2 TensorCores: make sure the 'parallel' row axis has >= 2 tiles.
    if _num_tensorcores() >= 2 and pl.cdiv(M, tm) < 2 and M > granule:
        tm = max(granule, _round_up((M + 1) // 2, granule))

    grid = (pl.cdiv(M, tm), pl.cdiv(ff_hidden, th))

    b1_2d = b1.reshape(1, ff_hidden)
    b2_2d = b2.reshape(1, d_model)

    # Cost estimate: weights are re-streamed from HBM once per row tile.
    n_row_tiles = grid[0]
    bytes_accessed = int(
        x2.size * x2.dtype.itemsize
        + M * d_model * jnp.dtype(x.dtype).itemsize
        + n_row_tiles * (w1.size * w1.dtype.itemsize
                         + w2.size * w2.dtype.itemsize
                         + b1.size * b1.dtype.itemsize
                         + b2.size * b2.dtype.itemsize))
    cost = pl.CostEstimate(
        flops=4 * M * d_model * ff_hidden,
        transcendentals=M * ff_hidden,
        bytes_accessed=bytes_accessed,
    )

    kernel = _make_ffn_kernel(th, ff_hidden, mask_tail)

    out = pl.pallas_call(
        kernel,
        out_shape=jax.ShapeDtypeStruct((M, d_model), x.dtype),
        grid_spec=pltpu.PrefetchScalarGridSpec(
            num_scalar_prefetch=0,
            grid=grid,
            in_specs=[
                pl.BlockSpec((tm, d_model), lambda i, h: (i, 0)),   # x tile (reused over h)
                pl.BlockSpec((d_model, th), lambda i, h: (0, h)),   # W1 column slab
                pl.BlockSpec((1, th), lambda i, h: (0, h)),         # b1 slice
                pl.BlockSpec((th, d_model), lambda i, h: (h, 0)),   # W2 row slab
                pl.BlockSpec((1, d_model), lambda i, h: (0, 0)),    # b2
            ],
            out_specs=pl.BlockSpec((tm, d_model), lambda i, h: (i, 0)),
            scratch_shapes=[pltpu.VMEM((tm, d_model), jnp.float32)],
        ),
        compiler_params=pltpu.CompilerParams(
            dimension_semantics=("parallel", "arbitrary"),
            vmem_limit_bytes=vmem_limit,
        ),
        cost_estimate=cost,
    )(x2, w1, b1_2d, w2, b2_2d)

    return out.reshape(orig_shape)


def _reference(x, w1, b1, w2, b2):
    h = x @ w1 + b1
    g = jax.nn.gelu(h, approximate=True)   # tanh-approx GELU, same as nn.GELU('tanh')
    return g @ w2 + b2


def _make_params(key, d_model, ff_hidden, dtype):
    k1, kb1, k2, kb2 = jax.random.split(key, 4)
    lim1 = 1.0 / math.sqrt(d_model)
    w1 = jax.random.uniform(k1, (d_model, ff_hidden), minval=-lim1, maxval=lim1,
                            dtype=jnp.float32).astype(dtype)
    b1 = jax.random.uniform(kb1, (ff_hidden,), minval=-lim1, maxval=lim1,
                            dtype=jnp.float32).astype(dtype)
    lim2 = 1.0 / math.sqrt(ff_hidden)
    w2 = jax.random.uniform(k2, (ff_hidden, d_model), minval=-lim2, maxval=lim2,
                            dtype=jnp.float32).astype(dtype)
    b2 = jax.random.uniform(kb2, (d_model,), minval=-lim2, maxval=lim2,
                            dtype=jnp.float32).astype(dtype)
    return w1, b1, w2, b2


if __name__ == "__main__":
    # Small config consistent with the module (ff_hidden = 4 * d_model).
    batch, seq, d_model, ff_hidden = 2, 16, 128, 512

    key = jax.random.PRNGKey(0)
    kx, kp, kp2 = jax.random.split(key, 3)

    x = jax.random.normal(kx, (batch, seq, d_model), dtype=jnp.float32)
    w1, b1, w2, b2 = _make_params(kp, d_model, ff_hidden, jnp.float32)

    # 1) f32 path (tight tolerance).
    out = feed_forward_pallas(x, w1, b1, w2, b2)
    out = jax.block_until_ready(out)
    ref = _reference(x, w1, b1, w2, b2)
    assert out.shape == (batch, seq, d_model)
    assert jnp.allclose(out, ref, atol=1e-4, rtol=1e-4), "f32 mismatch vs reference"

    # 2) bf16 activations/weights on the MXU with f32 accumulation (loose tol).
    xb = x.astype(jnp.bfloat16)
    w1b, b1b, w2b, b2b = (a.astype(jnp.bfloat16) for a in (w1, b1, w2, b2))
    out_bf = feed_forward_pallas(xb, w1b, b1b, w2b, b2b)
    out_bf = jax.block_until_ready(out_bf)
    assert jnp.allclose(out_bf.astype(jnp.float32), ref, atol=5e-2, rtol=5e-2), \
        "bf16 mismatch vs reference"

    # 3) Non-divisible ff_hidden exercising the masked tail H block.
    ffh2 = 320
    w1s, b1s, w2s, b2s = _make_params(kp2, d_model, ffh2, jnp.float32)
    out_m = feed_forward_pallas(x, w1s, b1s, w2s, b2s, tile_h=256)
    out_m = jax.block_until_ready(out_m)
    ref_m = _reference(x, w1s, b1s, w2s, b2s)
    assert jnp.allclose(out_m, ref_m, atol=1e-4, rtol=1e-4), \
        "masked-tail mismatch vs reference"

    print("KERNEL_OK")
</pallas_src>

<mosaic_0001>
module attributes {stable_mosaic.version = 11 : i64} {
  func.func @kernel(%arg0: i32, %arg1: i32, %arg2: memref<32x128xf32, #tpu.memory_space<vmem>>, %arg3: memref<128x512xf32, #tpu.memory_space<vmem>>, %arg4: memref<1x512xf32, #tpu.memory_space<vmem>>, %arg5: memref<512x128xf32, #tpu.memory_space<vmem>>, %arg6: memref<1x128xf32, #tpu.memory_space<vmem>>, %arg7: memref<32x128xf32, #tpu.memory_space<vmem>>, %arg8: memref<32x128xf32, #tpu.memory_space<vmem>>) attributes {dimension_semantics = [#tpu.dimension_semantics<parallel>, #tpu.dimension_semantics<arbitrary>], iteration_bounds = array<i64: 1, 1>, scalar_prefetch = 0 : i64, scratch_operands = 1 : i64, tpu.core_type = #tpu.core_type<tc>, window_params = [{transform_indices = @transform_0, window_bounds = array<i64: 32, 128>}, {transform_indices = @transform_1, window_bounds = array<i64: 128, 512>}, {transform_indices = @transform_2, window_bounds = array<i64: 1, 512>}, {transform_indices = @transform_3, window_bounds = array<i64: 512, 128>}, {pipeline_mode = #tpu.pipeline_mode<synchronous>, transform_indices = @transform_4, window_bounds = array<i64: 1, 128>}, {transform_indices = @transform_5, window_bounds = array<i64: 32, 128>}]} {
    %c0_i32 = arith.constant 0 : i32
    %0 = arith.cmpi eq, %arg1, %c0_i32 : i32
    %1 = arith.extui %0 : i1 to i32
    %c0_i32_0 = arith.constant 0 : i32
    %2 = arith.cmpi ne, %1, %c0_i32_0 : i32
    scf.if %2 {
      %cst_19 = arith.constant 0.000000e+00 : f32
      %30 = vector.broadcast %cst_19 : f32 to vector<32x128xf32>
      %c0_20 = arith.constant 0 : index
      %c0_21 = arith.constant 0 : index
      %31 = vector.load %arg8[%c0_20, %c0_21] : memref<32x128xf32, #tpu.memory_space<vmem>>, vector<32x128xf32>
      tpu.vector_store %arg8[%c0_20, %c0_21], %30 {strides = array<i32>} : memref<32x128xf32, #tpu.memory_space<vmem>>, vector<32x128xf32>,
    } else {
    }
    %c0 = arith.constant 0 : index
    %c0_1 = arith.constant 0 : index
    %3 = vector.load %arg2[%c0, %c0_1] : memref<32x128xf32, #tpu.memory_space<vmem>>, vector<32x128xf32>
    %c0_2 = arith.constant 0 : index
    %c0_3 = arith.constant 0 : index
    %4 = vector.load %arg3[%c0_2, %c0_3] : memref<128x512xf32, #tpu.memory_space<vmem>>, vector<128x512xf32>
    %cst = arith.constant dense<0.000000e+00> : vector<32x512xf32>
    %5 = tpu.matmul %3, %4, %cst {dimension_numbers = #tpu.dot_dimension_numbers<[1], [0], [0], [1], [0, 0, 1, 1], [], []>} : vector<32x128xf32>, vector<128x512xf32>, vector<32x512xf32> -> vector<32x512xf32>
    %c0_4 = arith.constant 0 : index
    %c0_5 = arith.constant 0 : index
    %6 = vector.load %arg4[%c0_4, %c0_5] : memref<1x512xf32, #tpu.memory_space<vmem>>, vector<1x512xf32>
    %7 = vector.broadcast %6 : vector<1x512xf32> to vector<32x512xf32>
    %8 = arith.addf %5, %7 : vector<32x512xf32>
    %9 = arith.mulf %8, %8 : vector<32x512xf32>
    %10 = arith.mulf %8, %9 : vector<32x512xf32>
    %cst_6 = arith.constant 4.471500e-02 : f32
    %11 = vector.broadcast %cst_6 : f32 to vector<32x512xf32>
    %12 = arith.mulf %11, %10 : vector<32x512xf32>
    %13 = arith.addf %8, %12 : vector<32x512xf32>
    %cst_7 = arith.constant 0.797884583 : f32
    %14 = vector.broadcast %cst_7 : f32 to vector<32x512xf32>
    %15 = arith.mulf %14, %13 : vector<32x512xf32>
    %16 = math.tanh %15 : vector<32x512xf32>
    %cst_8 = arith.constant 1.000000e+00 : f32
    %17 = vector.broadcast %cst_8 : f32 to vector<32x512xf32>
    %18 = arith.addf %17, %16 : vector<32x512xf32>
    %cst_9 = arith.constant 5.000000e-01 : f32
    %19 = vector.broadcast %cst_9 : f32 to vector<32x512xf32>
    %20 = arith.mulf %19, %18 : vector<32x512xf32>
    %21 = arith.mulf %8, %20 : vector<32x512xf32>
    %c0_10 = arith.constant 0 : index
    %c0_11 = arith.constant 0 : index
    %22 = vector.load %arg5[%c0_10, %c0_11] : memref<512x128xf32, #tpu.memory_space<vmem>>, vector<512x128xf32>
    %c0_12 = arith.constant 0 : index
    %c0_13 = arith.constant 0 : index
    %23 = vector.load %arg8[%c0_12, %c0_13] : memref<32x128xf32, #tpu.memory_space<vmem>>, vector<32x128xf32>
    %cst_14 = arith.constant dense<0.000000e+00> : vector<32x128xf32>
    %24 = tpu.matmul %21, %22, %cst_14 {dimension_numbers = #tpu.dot_dimension_numbers<[1], [0], [0], [1], [0, 0, 1, 1], [], []>} : vector<32x512xf32>, vector<512x128xf32>, vector<32x128xf32> -> vector<32x128xf32>
    %25 = arith.addf %23, %24 : vector<32x128xf32>
    %c0_15 = arith.constant 0 : index
    %c0_16 = arith.constant 0 : index
    %26 = vector.load %arg8[%c0_15, %c0_16] : memref<32x128xf32, #tpu.memory_space<vmem>>, vector<32x128xf32>
    tpu.vector_store %arg8[%c0_15, %c0_16], %25 {strides = array<i32>} : memref<32x128xf32, #tpu.memory_space<vmem>>, vector<32x128xf32>,
    %c0_i32_17 = arith.constant 0 : i32
    %27 = arith.cmpi eq, %arg1, %c0_i32_17 : i32
    %28 = arith.extui %27 : i1 to i32
    %c0_i32_18 = arith.constant 0 : i32
    %29 = arith.cmpi ne, %28, %c0_i32_18 : i32
    scf.if %29 {
      %c0_19 = arith.constant 0 : index
      %c0_20 = arith.constant 0 : index
      %30 = vector.load %arg8[%c0_19, %c0_20] : memref<32x128xf32, #tpu.memory_space<vmem>>, vector<32x128xf32>
      %c0_21 = arith.constant 0 : index
      %c0_22 = arith.constant 0 : index
      %31 = vector.load %arg6[%c0_21, %c0_22] : memref<1x128xf32, #tpu.memory_space<vmem>>, vector<1x128xf32>
      %32 = vector.broadcast %31 : vector<1x128xf32> to vector<32x128xf32>
      %33 = arith.addf %30, %32 : vector<32x128xf32>
      %c0_23 = arith.constant 0 : index
      %c0_24 = arith.constant 0 : index
      %34 = vector.load %arg7[%c0_23, %c0_24] : memref<32x128xf32, #tpu.memory_space<vmem>>, vector<32x128xf32>
      tpu.vector_store %arg7[%c0_23, %c0_24], %33 {strides = array<i32>} : memref<32x128xf32, #tpu.memory_space<vmem>>, vector<32x128xf32>,
    } else {
    }
    return
  }
  func.func @transform_0(%arg0: i32, %arg1: i32) -> (i32, i32) {
    %c0_i32 = arith.constant 0 : i32
    %c0_i32_0 = arith.constant 0 : i32
    return %arg0, %c0_i32 : i32, i32
  }
  func.func @transform_1(%arg0: i32, %arg1: i32) -> (i32, i32) {
    %c0_i32 = arith.constant 0 : i32
    %c0_i32_0 = arith.constant 0 : i32
    return %c0_i32, %arg1 : i32, i32
  }
  func.func @transform_2(%arg0: i32, %arg1: i32) -> (i32, i32) {
    %c0_i32 = arith.constant 0 : i32
    %c0_i32_0 = arith.constant 0 : i32
    return %c0_i32, %arg1 : i32, i32
  }
  func.func @transform_3(%arg0: i32, %arg1: i32) -> (i32, i32) {
    %c0_i32 = arith.constant 0 : i32
    %c0_i32_0 = arith.constant 0 : i32
    return %arg1, %c0_i32 : i32, i32
  }
  func.func @transform_4(%arg0: i32, %arg1: i32) -> (i32, i32) {
    %c0_i32 = arith.constant 0 : i32
    %c0_i32_0 = arith.constant 0 : i32
    %c0_i32_1 = arith.constant 0 : i32
    return %c0_i32, %c0_i32_0 : i32, i32
  }
  func.func @transform_5(%arg0: i32, %arg1: i32) -> (i32, i32) {
    %c0_i32 = arith.constant 0 : i32
    %c0_i32_0 = arith.constant 0 : i32
    return %arg0, %c0_i32 : i32, i32
  }
}

</mosaic_0001>

<bundles_post_ra>
// kernel: tpu_custom_call.1
= control target key start
LH: loop header
LB: loop body
LE: loop exit
PB: predicated region body
PF: predicated region fallthrough
CT: control target
= control target key end

     0   :  { %10 = vsyncpa [#allocation4], 0  ;;  %s1032_s0 = inlined_call_operand.hbm [shape: f32[32,128], index: 0, kind: input, shape index: {}]   ;;  %s1033_s1 = inlined_call_operand.hbm [shape: f32[128,512], index: 1, kind: input, shape index: {}]   ;;  %s1034_s2 = inlined_call_operand.hbm [shape: f32[1,512], index: 2, kind: input, shape index: {}]   ;;  %s1035_s3 = inlined_call_operand.hbm [shape: f32[512,128], index: 3, kind: input, shape index: {}]   ;;  %s1036_s4 = inlined_call_operand.vmem [shape: f32[1,128], index: 4, kind: input, shape index: {}]   ;;  %s1037_s5 = inlined_call_operand.hbm [shape: f32[32,128], index: 5, kind: output, shape index: {}]  }
   0x1   :  { %11 = vsyncpa [#allocation7], 0 }
   0x2   :  { %12 = vsyncpa [#allocation10], 0  ;;  %s31_s20 = sshll.u32 %s1033_s1, 4  ;;  %s32_s20 = int_to_ptr.hbm [resolvable:$true] %s31_s20 }
   0x3   :  { %13 = vsyncpa [#allocation5], 0  ;;  %s830_s21 = smov [#allocation6]   ;;  %s18_s25 = sshll.u32 %s1032_s0, 4  ;;  %s19_s25 = int_to_ptr.hbm [resolvable:$true] %s18_s25 }
   0x4   :  { %s33_s22 = sshll.u32 %s830_s21, 4  ;;  %s831_s26 = smov 512   ;;  %s34_s22 = int_to_ptr.vmem [resolvable:$true] %s33_s22 }
   0x5   :  { %s832_s27 = smov 32   ;;  %s833_s28 = smov [#allocation3]  }
   0x6   :  { %39 = dma.hbm_to_vmem [thread:$0]  %s32_s20, 8192, %s34_s22, [#allocation7], %s831_s26, %s831_s26, %s832_s27  }
   0x7   :  { %s20_s29 = sshll.u32 %s833_s28, 4  ;;  %s834_s30 = smov 128   ;;  %s21_s29 = int_to_ptr.vmem [resolvable:$true] %s20_s29 }
   0x8   :  { %s835_s6 = smov 8   ;;  %s45_s8 = sshll.u32 %s1034_s2, 4  ;;  %s46_s8 = int_to_ptr.hbm [resolvable:$true] %s45_s8 }
   0x9   :  { %26 = dma.hbm_to_vmem [thread:$0]  %s19_s25, 512, %s21_s29, [#allocation4], %s834_s30, %s834_s30, %s835_s6  }
   0xa   :  { %s836_s9 = smov [#allocation8]   ;;  %s55_s12 = sshll.u32 %s1035_s3, 4  ;;  %s56_s12 = int_to_ptr.hbm [resolvable:$true] %s55_s12 }
   0xb   :  { %s47_s0 = sshll.u32 %s836_s9, 4  ;;  %s837_s13 = smov [#allocation9]   ;;  %s48_s0 = int_to_ptr.vmem [resolvable:$true] %s47_s0 }
   0xc   :  { %50 = dma.hbm_to_vmem [thread:$0]  %s46_s8, 64, %s48_s0, [#allocation7]  }
   0xd   :  { %s57_s14 = sshll.u32 %s837_s13, 4  ;;  %s58_s14 = int_to_ptr.vmem [resolvable:$true] %s57_s14 }
   0xe   :  { %63 = dma.hbm_to_vmem [thread:$0]  %s56_s12, 8192, %s58_s14, [#allocation10], %s834_s30, %s834_s30, %s835_s6  }
   0xf   :  { %822 = dma.done.wait [#allocation4], 512  }
  0x10   :  { %823 = vsyncadd [#allocation4], 4294966784 }
  0x11   :  { %824 = dma.done.wait [#allocation7], 8256  }
  0x12   :  { %825 = vsyncadd [#allocation7], 4294959040 }
  0x13   :  { %826 = dma.done.wait [#allocation10], 8192  }
  0x14   :  { %827 = vsyncadd [#allocation10], 4294959104  ;;  %v154_v0 = vld [vmem:[#allocation6 + $0x1e0] sm:$0xff]  ;;  %v155_v1 = vld [vmem:[#allocation6 + $0x1e8] sm:$0xff]  ;;  %s645_s18 = sshll.u32 %s1037_s5, 4  ;;  %s646_s18 = int_to_ptr.hbm [resolvable:$true] %s645_s18 }
  0x15   :  { %v156_v2 = vld [vmem:[#allocation6 + $0x1f0] sm:$0xff]  ;;  %168 = vmatpush.msra.mxu0 %v154_v0  ;;  %197 = vmatpush.msra.mxu1 %v155_v1  ;;  %v157_v3 = vld [vmem:[#allocation6 + $0x1f8] sm:$0xff]  ;;  %v150_v4 = vld [vmem:[#allocation6 + $0x1c0] sm:$0xff] }
  0x16   :  { %v151_v5 = vld [vmem:[#allocation6 + $0x1c8] sm:$0xff]  ;;  %226 = vmatpush.msra.mxu2 %v156_v2  ;;  %255 = vmatpush.msra.mxu3 %v157_v3  ;;  %v152_v6 = vld [vmem:[#allocation6 + $0x1d0] sm:$0xff]  ;;  %v153_v7 = vld [vmem:[#allocation6 + $0x1d8] sm:$0xff] }
  0x17   :  { %v146_v8 = vld [vmem:[#allocation6 + $0x1a0] sm:$0xff]  ;;  %169 = vmatpush.msra.mxu0 %v150_v4  ;;  %198 = vmatpush.msra.mxu1 %v151_v5  ;;  %v147_v9 = vld [vmem:[#allocation6 + $0x1a8] sm:$0xff]  ;;  %v148_v10 = vld [vmem:[#allocation6 + $0x1b0] sm:$0xff] }
  0x18   :  { %v149_v11 = vld [vmem:[#allocation6 + $0x1b8] sm:$0xff]  ;;  %227 = vmatpush.msra.mxu2 %v152_v6  ;;  %256 = vmatpush.msra.mxu3 %v153_v7  ;;  %v142_v12 = vld [vmem:[#allocation6 + $0x180] sm:$0xff]  ;;  %v143_v13 = vld [vmem:[#allocation6 + $0x188] sm:$0xff] }
  0x19   :  { %170 = vmatpush.msra.mxu0 %v146_v8  ;;  %199 = vmatpush.msra.mxu1 %v147_v9  ;;  %v144_v14 = vld [vmem:[#allocation6 + $0x190] sm:$0xff]  ;;  %v145_v15 = vld [vmem:[#allocation6 + $0x198] sm:$0xff]  ;;  %v138_v16 = vld [vmem:[#allocation6 + $0x160] sm:$0xff] }
  0x1a   :  { %228 = vmatpush.msra.mxu2 %v148_v10  ;;  %257 = vmatpush.msra.mxu3 %v149_v11  ;;  %v139_v17 = vld [vmem:[#allocation6 + $0x168] sm:$0xff]  ;;  %v140_v18 = vld [vmem:[#allocation6 + $0x170] sm:$0xff]  ;;  %v141_v19 = vld [vmem:[#allocation6 + $0x178] sm:$0xff] }
  0x1b   :  { %171 = vmatpush.msra.mxu0 %v142_v12  ;;  %200 = vmatpush.msra.mxu1 %v143_v13  ;;  %v134_v20 = vld [vmem:[#allocation6 + $0x140] sm:$0xff]  ;;  %v135_v21 = vld [vmem:[#allocation6 + $0x148] sm:$0xff]  ;;  %v136_v22 = vld [vmem:[#allocation6 + $0x150] sm:$0xff] }
  0x1c   :  { %229 = vmatpush.msra.mxu2 %v144_v14  ;;  %258 = vmatpush.msra.mxu3 %v145_v15  ;;  %v137_v23 = vld [vmem:[#allocation6 + $0x158] sm:$0xff]  ;;  %v130_v24 = vld [vmem:[#allocation6 + $0x120] sm:$0xff]  ;;  %v131_v25 = vld [vmem:[#allocation6 + $0x128] sm:$0xff] }
  0x1d   :  { %172 = vmatpush.msra.mxu0 %v138_v16  ;;  %201 = vmatpush.msra.mxu1 %v139_v17  ;;  %v132_v26 = vld [vmem:[#allocation6 + $0x130] sm:$0xff]  ;;  %v133_v27 = vld [vmem:[#allocation6 + $0x138] sm:$0xff]  ;;  %v126_v28 = vld [vmem:[#allocation6 + $0x100] sm:$0xff] }
  0x1e   :  { %230 = vmatpush.msra.mxu2 %v140_v18  ;;  %259 = vmatpush.msra.mxu3 %v141_v19  ;;  %v127_v29 = vld [vmem:[#allocation6 + $0x108] sm:$0xff]  ;;  %v128_v30 = vld [vmem:[#allocation6 + $0x110] sm:$0xff]  ;;  %v129_v31 = vld [vmem:[#allocation6 + $0x118] sm:$0xff] }
  0x1f   :  { %173 = vmatpush.msra.mxu0 %v134_v20  ;;  %202 = vmatpush.msra.mxu1 %v135_v21  ;;  %v122_v32 = vld [vmem:[#allocation6 + $0xe0] sm:$0xff]  ;;  %v123_v33 = vld [vmem:[#allocation6 + $0xe8] sm:$0xff]  ;;  %v124_v34 = vld [vmem:[#allocation6 + $0xf0] sm:$0xff] }
  0x20   :  { %231 = vmatpush.msra.mxu2 %v136_v22  ;;  %260 = vmatpush.msra.mxu3 %v137_v23  ;;  %v125_v35 = vld [vmem:[#allocation6 + $0xf8] sm:$0xff]  ;;  %v118_v36 = vld [vmem:[#allocation6 + $0xc0] sm:$0xff]  ;;  %v119_v37 = vld [vmem:[#allocation6 + $0xc8] sm:$0xff] }
  0x21   :  { %174 = vmatpush.msra.mxu0 %v130_v24  ;;  %203 = vmatpush.msra.mxu1 %v131_v25  ;;  %v120_v38 = vld [vmem:[#allocation6 + $0xd0] sm:$0xff]  ;;  %v121_v39 = vld [vmem:[#allocation6 + $0xd8] sm:$0xff]  ;;  %v114_v40 = vld [vmem:[#allocation6 + $0xa0] sm:$0xff] }
  0x22   :  { %232 = vmatpush.msra.mxu2 %v132_v26  ;;  %261 = vmatpush.msra.mxu3 %v133_v27  ;;  %v115_v41 = vld [vmem:[#allocation6 + $0xa8] sm:$0xff]  ;;  %v116_v42 = vld [vmem:[#allocation6 + $0xb0] sm:$0xff]  ;;  %v117_v43 = vld [vmem:[#allocation6 + $0xb8] sm:$0xff] }
  0x23   :  { %175 = vmatpush.msra.mxu0 %v126_v28  ;;  %204 = vmatpush.msra.mxu1 %v127_v29  ;;  %v110_v44 = vld [vmem:[#allocation6 + $0x80] sm:$0xff]  ;;  %v111_v45 = vld [vmem:[#allocation6 + $0x88] sm:$0xff]  ;;  %v112_v46 = vld [vmem:[#allocation6 + $0x90] sm:$0xff] }
  0x24   :  { %233 = vmatpush.msra.mxu2 %v128_v30  ;;  %262 = vmatpush.msra.mxu3 %v129_v31  ;;  %v113_v47 = vld [vmem:[#allocation6 + $0x98] sm:$0xff]  ;;  %v106_v48 = vld [vmem:[#allocation6 + $0x60] sm:$0xff]  ;;  %v107_v49 = vld [vmem:[#allocation6 + $0x68] sm:$0xff] }
  0x25   :  { %176 = vmatpush.msra.mxu0 %v122_v32  ;;  %205 = vmatpush.msra.mxu1 %v123_v33  ;;  %v108_v50 = vld [vmem:[#allocation6 + $0x70] sm:$0xff]  ;;  %v109_v51 = vld [vmem:[#allocation6 + $0x78] sm:$0xff]  ;;  %v102_v52 = vld [vmem:[#allocation6 + $0x40] sm:$0xff] }
  0x26   :  { %234 = vmatpush.msra.mxu2 %v124_v34  ;;  %263 = vmatpush.msra.mxu3 %v125_v35  ;;  %v103_v53 = vld [vmem:[#allocation6 + $0x48] sm:$0xff]  ;;  %v104_v54 = vld [vmem:[#allocation6 + $0x50] sm:$0xff]  ;;  %v105_v55 = vld [vmem:[#allocation6 + $0x58] sm:$0xff] }
  0x27   :  { %177 = vmatpush.msra.mxu0 %v118_v36  ;;  %206 = vmatpush.msra.mxu1 %v119_v37  ;;  %v98_v56 = vld [vmem:[#allocation6 + $0x20] sm:$0xff]  ;;  %v99_v57 = vld [vmem:[#allocation6 + $0x28] sm:$0xff]  ;;  %v100_v58 = vld [vmem:[#allocation6 + $0x30] sm:$0xff] }
  0x28   :  { %235 = vmatpush.msra.mxu2 %v120_v38  ;;  %264 = vmatpush.msra.mxu3 %v121_v39  ;;  %v101_v59 = vld [vmem:[#allocation6 + $0x38] sm:$0xff]  ;;  %v94_v60 = vld [vmem:[#allocation6] sm:$0xff]  ;;  %v95_v61 = vld [vmem:[#allocation6 + $0x8] sm:$0xff] }
  0x29   :  { %178 = vmatpush.msra.mxu0 %v114_v40  ;;  %207 = vmatpush.msra.mxu1 %v115_v41  ;;  %v96_v62 = vld [vmem:[#allocation6 + $0x10] sm:$0xff]  ;;  %v97_v63 = vld [vmem:[#allocation6 + $0x18] sm:$0xff]  ;;  %v90_v0 = vld [vmem:[#allocation3] sm:$0xff] }
  0x2a   :  { %236 = vmatpush.msra.mxu2 %v116_v42  ;;  %265 = vmatpush.msra.mxu3 %v117_v43  ;;  %v443_v1 = vld [vmem:[#allocation9 + $0x78] sm:$0xff]  ;;  %v442_v3 = vld [vmem:[#allocation9 + $0x70] sm:$0xff]  ;;  %v441_v5 = vld [vmem:[#allocation9 + $0x68] sm:$0xff] }
  0x2b   :  { %179 = vmatpush.msra.mxu0 %v110_v44  ;;  %208 = vmatpush.msra.mxu1 %v111_v45  ;;  %v459_v2 = vld [vmem:[#allocation9 + $0xf8] sm:$0xff]  ;;  %v458_v4 = vld [vmem:[#allocation9 + $0xf0] sm:$0xff]  ;;  %v457_v6 = vld [vmem:[#allocation9 + $0xe8] sm:$0xff] }
  0x2c   :  { %237 = vmatpush.msra.mxu2 %v112_v46  ;;  %266 = vmatpush.msra.mxu3 %v113_v47  ;;  %v91_v7 = vld [vmem:[#allocation3 + $0x8] sm:$0xff]  ;;  %v92_v8 = vld [vmem:[#allocation3 + $0x10] sm:$0xff]  ;;  %v93_v9 = vld [vmem:[#allocation3 + $0x18] sm:$0xff] }
  0x2d   :  { %180 = vmatpush.msra.mxu0 %v106_v48  ;;  %209 = vmatpush.msra.mxu1 %v107_v49  ;;  %v475_v10 = vld [vmem:[#allocation9 + $0x178] sm:$0xff]  ;;  %v440_v11 = vld [vmem:[#allocation9 + $0x60] sm:$0xff]  ;;  %v474_v14 = vld [vmem:[#allocation9 + $0x170] sm:$0xff] }
  0x2e   :  { %238 = vmatpush.msra.mxu2 %v108_v50  ;;  %267 = vmatpush.msra.mxu3 %v109_v51  ;;  %v456_v12 = vld [vmem:[#allocation9 + $0xe0] sm:$0xff]  ;;  %v491_v13 = vld [vmem:[#allocation9 + $0x1f8] sm:$0xff]  ;;  %v490_v17 = vld [vmem:[#allocation9 + $0x1f0] sm:$0xff] }
  0x2f   :  { %181 = vmatpush.msra.mxu0 %v102_v52  ;;  %210 = vmatpush.msra.mxu1 %v103_v53  ;;  %v439_v15 = vld [vmem:[#allocation9 + $0x58] sm:$0xff]  ;;  %v473_v18 = vld [vmem:[#allocation9 + $0x168] sm:$0xff]  ;;  %v438_v19 = vld [vmem:[#allocation9 + $0x50] sm:$0xff] }
  0x30   :  { %239 = vmatpush.msra.mxu2 %v104_v54  ;;  %268 = vmatpush.msra.mxu3 %v105_v55  ;;  %v455_v16 = vld [vmem:[#allocation9 + $0xd8] sm:$0xff]  ;;  %v454_v20 = vld [vmem:[#allocation9 + $0xd0] sm:$0xff]  ;;  %v489_v21 = vld [vmem:[#allocation9 + $0x1e8] sm:$0xff] }
  0x31   :  { %182 = vmatpush.msra.mxu0 %v98_v56  ;;  %211 = vmatpush.msra.mxu1 %v99_v57  ;;  %v472_v22 = vld [vmem:[#allocation9 + $0x160] sm:$0xff]  ;;  %v437_v23 = vld [vmem:[#allocation9 + $0x48] sm:$0xff]  ;;  %v471_v26 = vld [vmem:[#allocation9 + $0x158] sm:$0xff] }
  0x32   :  { %240 = vmatpush.msra.mxu2 %v100_v58  ;;  %269 = vmatpush.msra.mxu3 %v101_v59  ;;  %v453_v24 = vld [vmem:[#allocation9 + $0xc8] sm:$0xff]  ;;  %v488_v25 = vld [vmem:[#allocation9 + $0x1e0] sm:$0xff]  ;;  %v487_v29 = vld [vmem:[#allocation9 + $0x1d8] sm:$0xff] }
  0x33   :  { %183 = vmatpush.msra.mxu0 %v94_v60  ;;  %212 = vmatpush.msra.mxu1 %v95_v61  ;;  %v436_v27 = vld [vmem:[#allocation9 + $0x40] sm:$0xff]  ;;  %v470_v30 = vld [vmem:[#allocation9 + $0x150] sm:$0xff]  ;;  %v435_v31 = vld [vmem:[#allocation9 + $0x38] sm:$0xff] }
  0x34   :  { %241 = vmatpush.msra.mxu2 %v96_v62  ;;  %270 = vmatpush.msra.mxu3 %v97_v63  ;;  %v452_v28 = vld [vmem:[#allocation9 + $0xc0] sm:$0xff]  ;;  %v451_v32 = vld [vmem:[#allocation9 + $0xb8] sm:$0xff]  ;;  %v486_v33 = vld [vmem:[#allocation9 + $0x1d0] sm:$0xff] }
  0x35   :  { %184 = vmatmul.f32.vlgmr.msra.gmra.mxu0 %v90_v0  ;;  %213 = vmatmul.f32.vlgmr.msra.gmra.mxu1 %v90_v0  ;;  %v469_v34 = vld [vmem:[#allocation9 + $0x148] sm:$0xff]  ;;  %v434_v35 = vld [vmem:[#allocation9 + $0x30] sm:$0xff]  ;;  %v468_v38 = vld [vmem:[#allocation9 + $0x140] sm:$0xff] }
  0x36   :  { %242 = vmatmul.f32.vlgmr.msra.gmra.mxu2 %v90_v0  ;;  %271 = vmatmul.f32.vlgmr.msra.gmra.mxu3 %v90_v0  ;;  %v450_v36 = vld [vmem:[#allocation9 + $0xb0] sm:$0xff]  ;;  %v485_v37 = vld [vmem:[#allocation9 + $0x1c8] sm:$0xff]  ;;  %v484_v41 = vld [vmem:[#allocation9 + $0x1c0] sm:$0xff] }
  0x37   :  { %496 = vmatpush.msrb.mxu0 %v443_v1  ;;  %525 = vmatpush.msrb.mxu1 %v459_v2  ;;  %v433_v39 = vld [vmem:[#allocation9 + $0x28] sm:$0xff]  ;;  %v467_v42 = vld [vmem:[#allocation9 + $0x138] sm:$0xff]  ;;  %v432_v43 = vld [vmem:[#allocation9 + $0x20] sm:$0xff] }
  0x38   :  { %554 = vmatpush.msrb.mxu2 %v475_v10  ;;  %583 = vmatpush.msrb.mxu3 %v491_v13  ;;  %v449_v40 = vld [vmem:[#allocation9 + $0xa8] sm:$0xff]  ;;  %v448_v44 = vld [vmem:[#allocation9 + $0xa0] sm:$0xff]  ;;  %v483_v45 = vld [vmem:[#allocation9 + $0x1b8] sm:$0xff] }
  0x39   :  { %497 = vmatpush.msrb.mxu0 %v442_v3  ;;  %526 = vmatpush.msrb.mxu1 %v458_v4  ;;  %v466_v46 = vld [vmem:[#allocation9 + $0x130] sm:$0xff]  ;;  %v431_v47 = vld [vmem:[#allocation9 + $0x18] sm:$0xff]  ;;  %v465_v50 = vld [vmem:[#allocation9 + $0x128] sm:$0xff] }
  0x3a   :  { %555 = vmatpush.msrb.mxu2 %v474_v14  ;;  %584 = vmatpush.msrb.mxu3 %v490_v17  ;;  %v447_v48 = vld [vmem:[#allocation9 + $0x98] sm:$0xff]  ;;  %v482_v49 = vld [vmem:[#allocation9 + $0x1b0] sm:$0xff]  ;;  %v481_v53 = vld [vmem:[#allocation9 + $0x1a8] sm:$0xff] }
  0x3b   :  { %498 = vmatpush.msrb.mxu0 %v441_v5  ;;  %527 = vmatpush.msrb.mxu1 %v457_v6  ;;  %v430_v51 = vld [vmem:[#allocation9 + $0x10] sm:$0xff]  ;;  %v464_v54 = vld [vmem:[#allocation9 + $0x120] sm:$0xff]  ;;  %v429_v55 = vld [vmem:[#allocation9 + $0x8] sm:$0xff] }
  0x3c   :  { %556 = vmatpush.msrb.mxu2 %v473_v18  ;;  %585 = vmatpush.msrb.mxu3 %v489_v21  ;;  %v446_v52 = vld [vmem:[#allocation9 + $0x90] sm:$0xff]  ;;  %v445_v56 = vld [vmem:[#allocation9 + $0x88] sm:$0xff]  ;;  %v480_v57 = vld [vmem:[#allocation9 + $0x1a0] sm:$0xff] }
  0x3d   :  { %187 = vmatmul.f32.gmra.mxu0 %v91_v7  ;;  %216 = vmatmul.f32.gmra.mxu1 %v91_v7  ;;  %v463_v58 = vld [vmem:[#allocation9 + $0x118] sm:$0xff]  ;;  %v428_v59 = vld [vmem:[#allocation9] sm:$0xff]  ;;  %v462_v63 = vld [vmem:[#allocation9 + $0x110] sm:$0xff] }
  0x3e   :  { %245 = vmatmul.f32.gmra.mxu2 %v91_v7  ;;  %274 = vmatmul.f32.gmra.mxu3 %v91_v7  ;;  %v444_v60 = vld [vmem:[#allocation9 + $0x80] sm:$0xff]  ;;  %v158_v61 = vld [vmem:[#allocation8] sm:$0xf]  ;;  %v478_v0 = vld [vmem:[#allocation9 + $0x190] sm:$0xff] }
  0x3f   :  { %499 = vmatpush.msrb.mxu0 %v440_v11  ;;  %528 = vmatpush.msrb.mxu1 %v456_v12  ;;  %v479_v62 = vld [vmem:[#allocation9 + $0x198] sm:$0xff]  ;;  %v887_v1 = vperm.slane %v158_v61, 0  ;;  %v889_v2 = vperm.slane %v158_v61, 1  ;;  %v461_v3 = vld [vmem:[#allocation9 + $0x108] sm:$0xff]  ;;  %v460_v5 = vld [vmem:[#allocation9 + $0x100] sm:$0xff]  ;;  %v901_v13 = vperm.slane %v158_v61, 2 }
  0x40   :  { %557 = vmatpush.msrb.mxu2 %v472_v22  ;;  %586 = vmatpush.msrb.mxu3 %v488_v25  ;;  %v477_v4 = vld [vmem:[#allocation9 + $0x188] sm:$0xff]  ;;  %v476_v6 = vld [vmem:[#allocation9 + $0x180] sm:$0xff]  ;;  %v903_v14 = vperm.slane %v158_v61, 3 }
  0x41   :  { %500 = vmatpush.msrb.mxu0 %v439_v15  ;;  %529 = vmatpush.msrb.mxu1 %v455_v16 }
  0x42   :  { %558 = vmatpush.msrb.mxu2 %v471_v26  ;;  %587 = vmatpush.msrb.mxu3 %v487_v29 }
  0x43   :  { %501 = vmatpush.msrb.mxu0 %v438_v19  ;;  %530 = vmatpush.msrb.mxu1 %v454_v20 }
  0x44   :  { %559 = vmatpush.msrb.mxu2 %v470_v30  ;;  %588 = vmatpush.msrb.mxu3 %v486_v33 }
  0x45   :  { %190 = vmatmul.f32.gmra.mxu0 %v92_v8  ;;  %219 = vmatmul.f32.gmra.mxu1 %v92_v8 }
  0x46   :  { %248 = vmatmul.f32.gmra.mxu2 %v92_v8  ;;  %277 = vmatmul.f32.gmra.mxu3 %v92_v8 }
  0x47   :  { %502 = vmatpush.msrb.mxu0 %v437_v23  ;;  %531 = vmatpush.msrb.mxu1 %v453_v24 }
  0x48   :  { %560 = vmatpush.msrb.mxu2 %v469_v34  ;;  %589 = vmatpush.msrb.mxu3 %v485_v37 }
  0x49   :  { %503 = vmatpush.msrb.mxu0 %v436_v27  ;;  %532 = vmatpush.msrb.mxu1 %v452_v28 }
  0x4a   :  { %561 = vmatpush.msrb.mxu2 %v468_v38  ;;  %590 = vmatpush.msrb.mxu3 %v484_v41 }
  0x4b   :  { %504 = vmatpush.msrb.mxu0 %v435_v31  ;;  %533 = vmatpush.msrb.mxu1 %v451_v32 }
  0x4c   :  { %562 = vmatpush.msrb.mxu2 %v467_v42  ;;  %591 = vmatpush.msrb.mxu3 %v483_v45 }
  0x4d   :  { %193 = vmatmul.f32.gmra.mxu0 %v93_v9  ;;  %222 = vmatmul.f32.gmra.mxu1 %v93_v9 }
  0x4e   :  { %251 = vmatmul.f32.gmra.mxu2 %v93_v9  ;;  %280 = vmatmul.f32.gmra.mxu3 %v93_v9 }
  0x4f   :  { %505 = vmatpush.msrb.mxu0 %v434_v35  ;;  %534 = vmatpush.msrb.mxu1 %v450_v36 }
  0x50   :  { %563 = vmatpush.msrb.mxu2 %v466_v46  ;;  %592 = vmatpush.msrb.mxu3 %v482_v49 }
  0x51   :  { %506 = vmatpush.msrb.mxu0 %v433_v39  ;;  %535 = vmatpush.msrb.mxu1 %v449_v40 }
  0x52   :  { %564 = vmatpush.msrb.mxu2 %v465_v50  ;;  %593 = vmatpush.msrb.mxu3 %v481_v53 }
  0x53   :  { %507 = vmatpush.msrb.mxu0 %v432_v43  ;;  %536 = vmatpush.msrb.mxu1 %v448_v44 }
  0x54   :  { %565 = vmatpush.msrb.mxu2 %v464_v54  ;;  %594 = vmatpush.msrb.mxu3 %v480_v57 }
  0x55   :  { %508 = vmatpush.msrb.mxu0 %v431_v47  ;;  %537 = vmatpush.msrb.mxu1 %v447_v48 }
  0x56   :  { %566 = vmatpush.msrb.mxu2 %v463_v58  ;;  %595 = vmatpush.msrb.mxu3 %v479_v62 }
  0x57   :  { %509 = vmatpush.msrb.mxu0 %v430_v51  ;;  %538 = vmatpush.msrb.mxu1 %v446_v52 }
  0x58   :  { %567 = vmatpush.msrb.mxu2 %v462_v63  ;;  %596 = vmatpush.msrb.mxu3 %v478_v0 }
  0x59   :  { %510 = vmatpush.msrb.mxu0 %v429_v55  ;;  %539 = vmatpush.msrb.mxu1 %v445_v56 }
  0x5a   :  { %568 = vmatpush.msrb.mxu2 %v461_v3  ;;  %597 = vmatpush.msrb.mxu3 %v477_v4 }
  0x5b   :  { %511 = vmatpush.msrb.mxu0 %v428_v59  ;;  %540 = vmatpush.msrb.mxu1 %v444_v60 }
  0x5c   :  { %569 = vmatpush.msrb.mxu2 %v460_v5  ;;  %598 = vmatpush.msrb.mxu3 %v476_v6 }
  0xb2   :  { %v185_v7 = vpop.f32.mrf.mxu0  ;;  %v214_v8 = vpop.f32.mrf.mxu1 }
  0xb3   :  { %v892_v9 = vadd.f32 %v185_v7, %v887_v1  ;;  %v895_v10 = vadd.f32 %v214_v8, %v889_v2 }
  0xb5   :  { %v284_v11 = vmul.f32 %v892_v9, %v892_v9  ;;  %v285_v12 = vmul.f32 %v895_v10, %v895_v10 }
  0xb7   :  { %v300_v15 = vmul.f32 %v284_v11, %v892_v9  ;;  %v301_v16 = vmul.f32 %v285_v12, %v895_v10 }
  0xb9   :  { %v316_v17 = vmul.f32 0.044715, %v300_v15  ;;  %v317_v18 = vmul.f32 0.044715, %v301_v16  ;;  %v243_v19 = vpop.f32.mrf.mxu2  ;;  %v272_v20 = vpop.f32.mrf.mxu3 }
  0xba   :  { %v908_v21 = vadd.f32 %v243_v19, %v901_v13  ;;  %v911_v22 = vadd.f32 %v272_v20, %v903_v14  ;;  %v188_v23 = vpop.f32.mrf.mxu0  ;;  %v217_v24 = vpop.f32.mrf.mxu1 }
  0xbb   :  { %v332_v25 = vadd.f32 %v316_v17, %v892_v9  ;;  %v333_v26 = vadd.f32 %v317_v18, %v895_v10  ;;  %v916_v27 = vadd.f32 %v188_v23, %v887_v1  ;;  %v919_v28 = vadd.f32 %v217_v24, %v889_v2 }
  0xbc   :  { %v286_v29 = vmul.f32 %v908_v21, %v908_v21  ;;  %v287_v30 = vmul.f32 %v911_v22, %v911_v22 }
  0xbd   :  { %v288_v31 = vmul.f32 %v916_v27, %v916_v27  ;;  %v289_v32 = vmul.f32 %v919_v28, %v919_v28  ;;  %v348_v33 = vmul.f32 0.7978846, %v332_v25  ;;  %v349_v34 = vmul.f32 0.7978846, %v333_v26 }
  0xbe   :  { %v302_v35 = vmul.f32 %v286_v29, %v908_v21  ;;  %v303_v36 = vmul.f32 %v287_v30, %v911_v22 }
  0xbf   :  { %v304_v37 = vmul.f32 %v288_v31, %v916_v27  ;;  %v305_v38 = vmul.f32 %v289_v32, %v919_v28  ;;  %670 = vtanh.f32 %v348_v33 }
  0xc0   :  { %v318_v39 = vmul.f32 0.044715, %v302_v35  ;;  %v319_v40 = vmul.f32 0.044715, %v303_v36  ;;  %672 = vtanh.f32 %v349_v34 }
  0xc1   :  { %v246_v41 = vpop.f32.mrf.mxu2  ;;  %v275_v42 = vpop.f32.mrf.mxu3  ;;  %v320_v43 = vmul.f32 0.044715, %v304_v37  ;;  %v321_v44 = vmul.f32 0.044715, %v305_v38 }
  0xc2   :  { %v334_v45 = vadd.f32 %v318_v39, %v908_v21  ;;  %v335_v46 = vadd.f32 %v319_v40, %v911_v22  ;;  %v936_v47 = vadd.f32 %v246_v41, %v901_v13  ;;  %v939_v48 = vadd.f32 %v275_v42, %v903_v14  ;;  %v191_v49 = vpop.f32.mrf.mxu0  ;;  %v220_v50 = vpop.f32.mrf.mxu1 }
  0xc3   :  { %v942_v51 = vadd.f32 %v191_v49, %v887_v1  ;;  %v945_v52 = vadd.f32 %v220_v50, %v889_v2  ;;  %v336_v53 = vadd.f32 %v320_v43, %v916_v27  ;;  %v337_v54 = vadd.f32 %v321_v44, %v919_v28 }
  0xc4   :  { %v290_v55 = vmul.f32 %v936_v47, %v936_v47  ;;  %v291_v56 = vmul.f32 %v939_v48, %v939_v48  ;;  %v350_v57 = vmul.f32 0.7978846, %v334_v45  ;;  %v351_v58 = vmul.f32 0.7978846, %v335_v46 }
  0xc5   :  { %v671_v59 = vpop.eup %670  ;;  %v292_v60 = vmul.f32 %v942_v51, %v942_v51  ;;  %v293_v61 = vmul.f32 %v945_v52, %v945_v52  ;;  %v352_v62 = vmul.f32 0.7978846, %v336_v53  ;;  %v353_v63 = vmul.f32 0.7978846, %v337_v54 }
  0xc6   :  { %v673_v0 = vpop.eup %672  ;;  %v306_v3 = vmul.f32 %v290_v55, %v936_v47  ;;  %v307_v4 = vmul.f32 %v291_v56, %v939_v48  ;;  %v380_v5 = vadd.f32 1.0, %v671_v59  ;;  %674 = vtanh.f32 %v350_v57 }
  0xc7   :  { %v308_v6 = vmul.f32 %v292_v60, %v942_v51  ;;  %v309_v7 = vmul.f32 %v293_v61, %v945_v52  ;;  %v381_v8 = vadd.f32 1.0, %v673_v0  ;;  %676 = vtanh.f32 %v351_v58 }
  0xc8   :  { %v396_v11 = vmul.f32 0.5, %v380_v5  ;;  %678 = vtanh.f32 %v352_v62  ;;  %v322_v12 = vmul.f32 0.044715, %v306_v3  ;;  %v323_v15 = vmul.f32 0.044715, %v307_v4 }
  0xc9   :  { %v249_v16 = vpop.f32.mrf.mxu2  ;;  %v278_v17 = vpop.f32.mrf.mxu3  ;;  %v397_v18 = vmul.f32 0.5, %v381_v8  ;;  %680 = vtanh.f32 %v353_v63  ;;  %v324_v19 = vmul.f32 0.044715, %v308_v6  ;;  %v325_v20 = vmul.f32 0.044715, %v309_v7 }
  0xca   :  { %v962_v23 = vadd.f32 %v249_v16, %v901_v13  ;;  %v965_v24 = vadd.f32 %v278_v17, %v903_v14  ;;  %v194_v25 = vpop.f32.mrf.mxu0  ;;  %v223_v26 = vpop.f32.mrf.mxu1  ;;  %v412_v29 = vmul.f32 %v396_v11, %v892_v9  ;;  %v338_v30 = vadd.f32 %v322_v12, %v936_v47 }
  0xcb   :  { %v970_v31 = vadd.f32 %v194_v25, %v887_v1  ;;  %v973_v32 = vadd.f32 %v223_v26, %v889_v2  ;;  %v413_v33 = vmul.f32 %v397_v18, %v895_v10  ;;  %v339_v34 = vadd.f32 %v323_v15, %v939_v48 }
  0xcc   :  { %v675_v35 = vpop.eup %674  ;;  %v294_v36 = vmul.f32 %v962_v23, %v962_v23  ;;  %v295_v37 = vmul.f32 %v965_v24, %v965_v24  ;;  %512 = vmatmul.f32.vlgmr.msrb.gmra.mxu0 %v412_v29  ;;  %v354_v9 = vmul.f32 0.7978846, %v338_v30  ;;  %v340_v38 = vadd.f32 %v324_v19, %v942_v51 }
  0xcd   :  { %v677_v1 = vpop.eup %676  ;;  %v296_v2 = vmul.f32 %v970_v31, %v970_v31  ;;  %v297_v10 = vmul.f32 %v973_v32, %v973_v32  ;;  %541 = vmatmul.f32.vlgmr.msrb.gmra.mxu1 %v413_v33  ;;  %v382_v39 = vadd.f32 1.0, %v675_v35  ;;  %v355_v40 = vmul.f32 0.7978846, %v339_v34 }
  0xce   :  { %v679_v41 = vpop.eup %678  ;;  %v310_v42 = vmul.f32 %v294_v36, %v962_v23  ;;  %v311_v43 = vmul.f32 %v295_v37, %v965_v24  ;;  %v383_v44 = vadd.f32 1.0, %v677_v1  ;;  %682 = vtanh.f32 %v354_v9 }
  0xcf   :  { %v681_v45 = vpop.eup %680  ;;  %v312_v46 = vmul.f32 %v296_v2, %v970_v31  ;;  %v313_v49 = vmul.f32 %v297_v10, %v973_v32  ;;  %v398_v50 = vmul.f32 0.5, %v382_v39  ;;  %v384_v53 = vadd.f32 1.0, %v679_v41 }
  0xd0   :  { %v399_v54 = vmul.f32 0.5, %v383_v44  ;;  %v385_v55 = vadd.f32 1.0, %v681_v45  ;;  %684 = vtanh.f32 %v355_v40  ;;  %v356_v56 = vmul.f32 0.7978846, %v340_v38 }
  0xd1   :  { %v252_v57 = vpop.f32.mrf.mxu2  ;;  %v281_v58 = vpop.f32.mrf.mxu3  ;;  %v414_v59 = vmul.f32 %v398_v50, %v908_v21  ;;  %v400_v60 = vmul.f32 0.5, %v384_v53  ;;  %v341_v61 = vadd.f32 %v325_v20, %v945_v52  ;;  %v326_v62 = vmul.f32 0.044715, %v310_v42 }
  0xd2   :  { %v993_v63 = vadd.f32 %v252_v57, %v901_v13  ;;  %v996_v0 = vadd.f32 %v281_v58, %v903_v14  ;;  %v415_v3 = vmul.f32 %v399_v54, %v911_v22  ;;  %v401_v4 = vmul.f32 0.5, %v385_v55 }
  0xd3   :  { %570 = vmatmul.f32.vlgmr.msrb.gmra.mxu2 %v414_v59  ;;  %v416_v5 = vmul.f32 %v400_v60, %v916_v27  ;;  %686 = vtanh.f32 %v356_v56  ;;  %v357_v6 = vmul.f32 0.7978846, %v341_v61  ;;  %v342_v21 = vadd.f32 %v326_v62, %v962_v23 }
  0xd4   :  { %v683_v7 = vpop.eup %682  ;;  %v298_v8 = vmul.f32 %v993_v63, %v993_v63  ;;  %v299_v13 = vmul.f32 %v996_v0, %v996_v0  ;;  %599 = vmatmul.f32.vlgmr.msrb.gmra.mxu3 %v415_v3  ;;  %v417_v14 = vmul.f32 %v401_v4, %v919_v28  ;;  %v327_v11 = vmul.f32 0.044715, %v311_v43 }
  0xd5   :  { %515 = vmatmul.f32.gmra.mxu0 %v416_v5  ;;  %v386_v22 = vadd.f32 1.0, %v683_v7  ;;  %688 = vtanh.f32 %v357_v6  ;;  %v358_v12 = vmul.f32 0.7978846, %v342_v21  ;;  %v328_v27 = vmul.f32 0.044715, %v312_v46 }
  0xd6   :  { %v685_v15 = vpop.eup %684  ;;  %v314_v16 = vmul.f32 %v298_v8, %v993_v63  ;;  %v315_v17 = vmul.f32 %v299_v13, %v996_v0  ;;  %544 = vmatmul.f32.gmra.mxu1 %v417_v14  ;;  %v343_v18 = vadd.f32 %v327_v11, %v965_v24  ;;  %v329_v19 = vmul.f32 0.044715, %v313_v49 }
  0xd7   :  { %v402_v20 = vmul.f32 0.5, %v386_v22  ;;  %v387_v25 = vadd.f32 1.0, %v685_v15  ;;  %690 = vtanh.f32 %v358_v12  ;;  %v344_v28 = vadd.f32 %v328_v27, %v970_v31 }
  0xd8   :  { %v359_v26 = vmul.f32 0.7978846, %v343_v18  ;;  %v345_v29 = vadd.f32 %v329_v19, %v973_v32  ;;  %v330_v30 = vmul.f32 0.044715, %v314_v16  ;;  %v331_v33 = vmul.f32 0.044715, %v315_v17 }
  0xd9   :  { %v687_v34 = vpop.eup %686  ;;  %v418_v35 = vmul.f32 %v402_v20, %v936_v47  ;;  %v403_v36 = vmul.f32 0.5, %v387_v25  ;;  %v360_v37 = vmul.f32 0.7978846, %v344_v28 }
  0xda   :  { %v388_v9 = vadd.f32 1.0, %v687_v34  ;;  %692 = vtanh.f32 %v359_v26  ;;  %v361_v38 = vmul.f32 0.7978846, %v345_v29  ;;  %v346_v1 = vadd.f32 %v330_v30, %v993_v63 }
  0xdb   :  { %v689_v2 = vpop.eup %688  ;;  %573 = vmatmul.f32.gmra.mxu2 %v418_v35  ;;  %v419_v10 = vmul.f32 %v403_v36, %v939_v48  ;;  %694 = vtanh.f32 %v360_v37  ;;  %v347_v39 = vadd.f32 %v331_v33, %v996_v0 }
  0xdc   :  { %v404_v40 = vmul.f32 0.5, %v388_v9  ;;  %v389_v41 = vadd.f32 1.0, %v689_v2  ;;  %696 = vtanh.f32 %v361_v38  ;;  %v362_v42 = vmul.f32 0.7978846, %v346_v1 }
  0xdd   :  { %v691_v43 = vpop.eup %690  ;;  %602 = vmatmul.f32.gmra.mxu3 %v419_v10  ;;  %v363_v47 = vmul.f32 0.7978846, %v347_v39 }
  0xde   :  { %v420_v44 = vmul.f32 %v404_v40, %v942_v51  ;;  %v405_v45 = vmul.f32 0.5, %v389_v41  ;;  %v390_v46 = vadd.f32 1.0, %v691_v43  ;;  %698 = vtanh.f32 %v362_v42 }
  0xdf   :  { %700 = vtanh.f32 %v363_v47 }
  0xe0   :  { %v693_v49 = vpop.eup %692  ;;  %518 = vmatmul.f32.gmra.mxu0 %v420_v44  ;;  %v421_v48 = vmul.f32 %v405_v45, %v945_v52  ;;  %v406_v50 = vmul.f32 0.5, %v390_v46 }
  0xe1   :  { %v695_v53 = vpop.eup %694  ;;  %v391_v54 = vadd.f32 1.0, %v693_v49 }
  0xe2   :  { %v697_v55 = vpop.eup %696  ;;  %547 = vmatmul.f32.gmra.mxu1 %v421_v48  ;;  %v422_v56 = vmul.f32 %v406_v50, %v962_v23  ;;  %v392_v57 = vadd.f32 1.0, %v695_v53 }
  0xe3   :  { %v407_v58 = vmul.f32 0.5, %v391_v54  ;;  %v393_v59 = vadd.f32 1.0, %v697_v55 }
  0xe4   :  { %v699_v60 = vpop.eup %698  ;;  %576 = vmatmul.f32.gmra.mxu2 %v422_v56  ;;  %v408_v51 = vmul.f32 0.5, %v392_v57 }
  0xe5   :  { %v701_v61 = vpop.eup %700  ;;  %v423_v62 = vmul.f32 %v407_v58, %v965_v24  ;;  %v409_v3 = vmul.f32 0.5, %v393_v59  ;;  %v394_v4 = vadd.f32 1.0, %v699_v60 }
  0xe6   :  { %v424_v52 = vmul.f32 %v408_v51, %v970_v31  ;;  %v395_v5 = vadd.f32 1.0, %v701_v61 }
  0xe7   :  { %605 = vmatmul.f32.gmra.mxu3 %v423_v62  ;;  %v425_v6 = vmul.f32 %v409_v3, %v973_v32  ;;  %v410_v21 = vmul.f32 0.5, %v394_v4  ;;  %v669_v32 = vld [vmem:[%s1036_s4] ss:$0 sm:$0xff]  ;;  %s838_s4 = smov [#allocation11]  }
  0xe8   :  { %521 = vmatmul.f32.gmra.mxu0 %v424_v52  ;;  %v411_v23 = vmul.f32 0.5, %v395_v5  ;;  %s643_s15 = sshll.u32 %s838_s4, 4  ;;  %s644_s15 = int_to_ptr.vmem [resolvable:$true] %s643_s15 }
  0xe9   :  { %v426_v7 = vmul.f32 %v410_v21, %v993_v63 }
  0xea   :  { %550 = vmatmul.f32.gmra.mxu1 %v425_v6  ;;  %v427_v8 = vmul.f32 %v411_v23, %v996_v0 }
  0xec   :  { %579 = vmatmul.f32.gmra.mxu2 %v426_v7 }
  0xef   :  { %608 = vmatmul.f32.gmra.mxu3 %v427_v8 }
 0x149   :  { %v513_v13 = vpop.f32.mrf.mxu0 }
 0x14a   :  { %v542_v24 = vpop.f32.mrf.mxu1 }
 0x14b   :  { %v543_v14 = vadd.f32 %v542_v24, %v513_v13 }
 0x152   :  { %v516_v11 = vpop.f32.mrf.mxu0 }
 0x153   :  { %v545_v31 = vpop.f32.mrf.mxu1 }
 0x154   :  { %v546_v63 = vadd.f32 %v545_v31, %v516_v11 }
 0x156   :  { %v571_v22 = vpop.f32.mrf.mxu2 }
 0x157   :  { %v572_v12 = vadd.f32 %v571_v22, %v543_v14  ;;  %v600_v27 = vpop.f32.mrf.mxu3 }
 0x159   :  { %v601_v15 = vadd.f32 %v600_v27, %v572_v12 }
 0x15b   :  { %v631_v16 = vadd.f32 %v669_v32, %v601_v15 }
 0x15d   :  { %635 = vst [vmem:[#allocation11] sm:$0xff] %v631_v16  ;;  %v519_v19 = vpop.f32.mrf.mxu0 }
 0x15e   :  { %v574_v17 = vpop.f32.mrf.mxu2 }
 0x15f   :  { %v575_v0 = vadd.f32 %v574_v17, %v546_v63  ;;  %v548_v20 = vpop.f32.mrf.mxu1 }
 0x160   :  { %v603_v18 = vpop.f32.mrf.mxu3  ;;  %v549_v26 = vadd.f32 %v548_v20, %v519_v19 }
 0x161   :  { %v604_v25 = vadd.f32 %v603_v18, %v575_v0 }
 0x163   :  { %v632_v28 = vadd.f32 %v669_v32, %v604_v25 }
 0x165   :  { %636 = vst [vmem:[#allocation11 + $0x8] sm:$0xff] %v632_v28  ;;  %v522_v34 = vpop.f32.mrf.mxu0 }
 0x167   :  { %v577_v29 = vpop.f32.mrf.mxu2  ;;  %v551_v35 = vpop.f32.mrf.mxu1 }
 0x168   :  { %v578_v30 = vadd.f32 %v577_v29, %v549_v26  ;;  %v552_v9 = vadd.f32 %v551_v35, %v522_v34 }
 0x16a   :  { %v606_v33 = vpop.f32.mrf.mxu3 }
 0x16b   :  { %v607_v36 = vadd.f32 %v606_v33, %v578_v30 }
 0x16d   :  { %v633_v37 = vadd.f32 %v669_v32, %v607_v36 }
 0x16f   :  { %637 = vst [vmem:[#allocation11 + $0x10] sm:$0xff] %v633_v37  ;;  %v580_v38 = vpop.f32.mrf.mxu2 }
 0x170   :  { %v581_v1 = vadd.f32 %v580_v38, %v552_v9 }
 0x172   :  { %v609_v2 = vpop.f32.mrf.mxu3 }
 0x173   :  { %v610_v10 = vadd.f32 %v609_v2, %v581_v1 }
 0x175   :  { %v634_v39 = vadd.f32 %v669_v32, %v610_v10 }
 0x177   :  { %638 = vst [vmem:[#allocation11 + $0x18] sm:$0xff] %v634_v39 }
 0x178   :  { %651 = dma.vmem_to_hbm [thread:$0]  %s644_s15, 512, %s646_s18, [#allocation5], %s834_s30, %s834_s30, %s835_s6  }
 0x179   :  { %828 = dma.done.wait [#allocation5], 512  }
 0x17a   :  { %829 = vsyncadd [#allocation5], 4294966784 }
 0x17b   :  { %656 = vsyncpa [#allocation4], 1 }
 0x17c   :  { %657 = vsyncpa [#allocation7], 1 }
 0x17d   :  { %658 = vsyncpa [#allocation10], 1 }
 0x17e   :  { %659 = vsyncpa [#allocation5], 1 }

</bundles_post_ra>
